<compile_context>
chip_gen: v5e
topology: v5e:2x2
jax: 0.10.0
libtpu: 0.0.40
codegen_flags: <defaults>
</compile_context>

<pallas_src>
import functools

import jax
import jax.numpy as jnp
from jax.experimental import pallas as pl
from jax.experimental.pallas import tpu as pltpu

IN_FEATURES = 8
LATENT_SIZE = 32
NONLINEAR = "noop"               # matches `nonlinear = 'noop'` in the reference script

PACK = 16                        # 16 rows x 8 features = 128 lanes (one full vreg lane row)
PACKED_DIM = PACK * IN_FEATURES  # 128
TM_MIN = 1024                    # 512 KiB/block: DMA time >= ~0.35us per-step overhead
TM_MAX = 4096                    # 2 MiB/block: 2 x (in+out) double buffers ~= 8 MiB VMEM
TM_MAX_UNFUSED = 2048            # fallback keeps the [TM, 16*latent] hidden modest


def _round_up(a, m):
    return (a + m - 1) // m * m


def _pack_rows(x):
    """[B, 8] -> [R8, 128] lane-dense slab; pad rows only to a 128-row multiple."""
    B = x.shape[0]
    R = -(-B // PACK)                       # packed rows needed
    R8 = _round_up(max(R, 1), 8)            # sublane-aligned packed-row count
    Bp = R8 * PACK
    if Bp != B:
        x = jnp.pad(x, ((0, Bp - B), (0, 0)))
    return x.reshape(R8, PACKED_DIM), Bp, R8


def _pick_tile(R8, tm_max):
    tm = _round_up(-(-R8 // 8), 8)          # aim for ~8 grid steps (v7x: 2 TCs x pipeline)
    tm = max(TM_MIN, min(tm_max, tm))
    return min(tm, R8)                      # small batches: one full-array block


# ----------------------------------------------------------------------------
# Fast path: fused + lane-packed single matmul (valid only for 'noop').
# ----------------------------------------------------------------------------
def _fused_packed_kernel(xp_ref, wb_ref, bb_ref, o_ref):
    # xp_ref: [TM, 128]  wb_ref: [128, 128]  bb_ref: [1, 128]  o_ref: [TM, 128]
    y = jnp.dot(xp_ref[...], wb_ref[...], preferred_element_type=jnp.float32)
    o_ref[...] = (y + bb_ref[...]).astype(o_ref.dtype)


def _forward_fused_packed(x, w1, b1, w2, b2):
    B = x.shape[0]

    # Fold the two linears:  y = x @ (W1^T @ W2^T) + (b1 @ W2^T + b2)
    wf = jnp.dot(w1.T, w2.T)                                   # [8, 8]
    bf = jnp.dot(b1, w2.T) + b2                                # [8]
    w_block = jnp.kron(jnp.eye(PACK, dtype=wf.dtype), wf)      # [128, 128] block-diag
    b_tiled = jnp.tile(bf, PACK).reshape(1, PACKED_DIM)        # [1, 128]

    xp, Bp, R8 = _pack_rows(x)
    TM = _pick_tile(R8, TM_MAX)
    grid = (pl.cdiv(R8, TM),)                                  # partial tail block OK

    out_packed = pl.pallas_call(
        _fused_packed_kernel,
        out_shape=jax.ShapeDtypeStruct((R8, PACKED_DIM), x.dtype),
        grid_spec=pltpu.PrefetchScalarGridSpec(
            num_scalar_prefetch=0,
            grid=grid,
            in_specs=[
                pl.BlockSpec((TM, PACKED_DIM), lambda i: (i, 0)),          # streamed batch
                pl.BlockSpec((PACKED_DIM, PACKED_DIM), lambda i: (0, 0)),  # resident weight
                pl.BlockSpec((1, PACKED_DIM), lambda i: (0, 0)),           # resident bias
            ],
            out_specs=pl.BlockSpec((TM, PACKED_DIM), lambda i: (i, 0)),
        ),
        compiler_params=pltpu.CompilerParams(
            dimension_semantics=("parallel",),       # megacore sharding on v7x
            vmem_limit_bytes=32 * 1024 * 1024,       # ~8 MiB used; safe on v5e/v6e/v7x
        ),
    )(xp, w_block, b_tiled)

    out = out_packed.reshape(Bp, IN_FEATURES)
    return out if Bp == B else out[:B]


# ----------------------------------------------------------------------------
# Fallback (relu / sigmoid): lane-packed two-matmul kernel, same batch grid.
# ----------------------------------------------------------------------------
def _unfused_packed_kernel(xp_ref, w1b_ref, b1t_ref, w2b_ref, b2t_ref, o_ref, *, nonlinear):
    h = jnp.dot(xp_ref[...], w1b_ref[...], preferred_element_type=jnp.float32) + b1t_ref[...]
    if nonlinear == "relu":
        h = jnp.maximum(h, 0.0)
    elif nonlinear == "sigmoid":
        h = jax.nn.sigmoid(h)
    y = jnp.dot(h, w2b_ref[...], preferred_element_type=jnp.float32) + b2t_ref[...]
    o_ref[...] = y.astype(o_ref.dtype)


def _forward_unfused_packed(x, w1, b1, w2, b2, nonlinear):
    B = x.shape[0]
    latent = w1.shape[0]
    hid = PACK * latent

    # Block-diagonal weights keep the 16 packed rows independent; the
    # nonlinearity is elementwise, so packing commutes with it.
    w1b = jnp.kron(jnp.eye(PACK, dtype=w1.dtype), w1.T)        # [128, 16*latent]
    w2b = jnp.kron(jnp.eye(PACK, dtype=w2.dtype), w2.T)        # [16*latent, 128]
    b1t = jnp.tile(b1, PACK).reshape(1, hid)
    b2t = jnp.tile(b2, PACK).reshape(1, PACKED_DIM)

    xp, Bp, R8 = _pack_rows(x)
    TM = _pick_tile(R8, TM_MAX_UNFUSED)
    grid = (pl.cdiv(R8, TM),)

    kernel = functools.partial(_unfused_packed_kernel, nonlinear=nonlinear)
    out_packed = pl.pallas_call(
        kernel,
        out_shape=jax.ShapeDtypeStruct((R8, PACKED_DIM), x.dtype),
        grid_spec=pltpu.PrefetchScalarGridSpec(
            num_scalar_prefetch=0,
            grid=grid,
            in_specs=[
                pl.BlockSpec((TM, PACKED_DIM), lambda i: (i, 0)),
                pl.BlockSpec((PACKED_DIM, hid), lambda i: (0, 0)),
                pl.BlockSpec((1, hid), lambda i: (0, 0)),
                pl.BlockSpec((hid, PACKED_DIM), lambda i: (0, 0)),
                pl.BlockSpec((1, PACKED_DIM), lambda i: (0, 0)),
            ],
            out_specs=pl.BlockSpec((TM, PACKED_DIM), lambda i: (i, 0)),
        ),
        compiler_params=pltpu.CompilerParams(
            dimension_semantics=("parallel",),
            vmem_limit_bytes=32 * 1024 * 1024,
        ),
    )(xp, w1b, b1t, w2b, b2t)

    out = out_packed.reshape(Bp, IN_FEATURES)
    return out if Bp == B else out[:B]


# ----------------------------------------------------------------------------
# Public forward (PyTorch nn.Linear parameter conventions), jitted.
# ----------------------------------------------------------------------------
@functools.partial(jax.jit, static_argnames="nonlinear")
def my_autoencoder_forward(x, w1, b1, w2, b2, *, nonlinear=NONLINEAR):
    """x: [B, 8] f32.  w1: [latent, 8], b1: [latent], w2: [8, latent], b2: [8]."""
    if nonlinear == "noop":
        return _forward_fused_packed(x, w1, b1, w2, b2)
    if nonlinear in ("relu", "sigmoid"):
        return _forward_unfused_packed(x, w1, b1, w2, b2, nonlinear)
    raise ValueError(f"unknown nonlinearity {nonlinear}")


def _reference_forward(x, w1, b1, w2, b2, nonlinear=NONLINEAR):
    h = x @ w1.T + b1
    if nonlinear == "relu":
        h = jnp.maximum(h, 0.0)
    elif nonlinear == "sigmoid":
        h = jax.nn.sigmoid(h)
    return h @ w2.T + b2


if __name__ == "__main__":
    key = jax.random.PRNGKey(0)
    k_x, k_w1, k_b1, k_w2, k_b2, k_x2, k_x3 = jax.random.split(key, 7)

    # Deterministic synthetic parameters (PyTorch nn.Linear shapes).
    bound1 = 1.0 / (IN_FEATURES ** 0.5)
    bound2 = 1.0 / (LATENT_SIZE ** 0.5)
    w1 = jax.random.uniform(k_w1, (LATENT_SIZE, IN_FEATURES), jnp.float32, -bound1, bound1)
    b1 = jax.random.uniform(k_b1, (LATENT_SIZE,), jnp.float32, -bound1, bound1)
    w2 = jax.random.uniform(k_w2, (IN_FEATURES, LATENT_SIZE), jnp.float32, -bound2, bound2)
    b2 = jax.random.uniform(k_b2, (IN_FEATURES,), jnp.float32, -bound2, bound2)

    # Small batch (matches the reference training-loop scale).
    B = 16
    x = jax.random.normal(k_x, (B, IN_FEATURES), dtype=jnp.float32)
    out = jax.block_until_ready(my_autoencoder_forward(x, w1, b1, w2, b2))
    assert out.shape == (B, IN_FEATURES)
    assert jnp.allclose(out, _reference_forward(x, w1, b1, w2, b2), atol=1e-5, rtol=1e-5)

    # Batch not a multiple of the 16-row pack (exercises the small pad + slice path).
    x2 = jax.random.normal(k_x2, (1000, IN_FEATURES), dtype=jnp.float32)
    out2 = jax.block_until_ready(my_autoencoder_forward(x2, w1, b1, w2, b2))
    assert jnp.allclose(out2, _reference_forward(x2, w1, b1, w2, b2), atol=1e-5, rtol=1e-5)

    # Larger batch: multi-step pipelined grid with a partial boundary block
    # (100000 rows -> 6250 packed rows -> 6256 padded -> TM=1024 -> 7 grid steps).
    x3 = jax.random.normal(k_x3, (100_000, IN_FEATURES), dtype=jnp.float32)
    out3 = jax.block_until_ready(my_autoencoder_forward(x3, w1, b1, w2, b2))
    assert jnp.allclose(out3, _reference_forward(x3, w1, b1, w2, b2), atol=1e-5, rtol=1e-5)

    # Fallback (relu) path: lane-packed two-matmul kernel.
    out_r = jax.block_until_ready(
        my_autoencoder_forward(x2, w1, b1, w2, b2, nonlinear="relu"))
    assert jnp.allclose(out_r, _reference_forward(x2, w1, b1, w2, b2, "relu"),
                        atol=1e-5, rtol=1e-5)

    print("KERNEL_OK")
</pallas_src>

<mosaic_0001>
module attributes {stable_mosaic.version = 11 : i64} {
  func.func @_fused_packed_kernel(%arg0: i32, %arg1: memref<8x128xf32, #tpu.memory_space<vmem>>, %arg2: memref<128x128xf32, #tpu.memory_space<vmem>>, %arg3: memref<1x128xf32, #tpu.memory_space<vmem>>, %arg4: memref<8x128xf32, #tpu.memory_space<vmem>>) attributes {dimension_semantics = [#tpu.dimension_semantics<parallel>], iteration_bounds = array<i64: 1>, scalar_prefetch = 0 : i64, scratch_operands = 0 : i64, tpu.core_type = #tpu.core_type<tc>, window_params = [{transform_indices = @transform_0, window_bounds = array<i64: 8, 128>}, {pipeline_mode = #tpu.pipeline_mode<synchronous>, transform_indices = @transform_1, window_bounds = array<i64: 128, 128>}, {pipeline_mode = #tpu.pipeline_mode<synchronous>, transform_indices = @transform_2, window_bounds = array<i64: 1, 128>}, {transform_indices = @transform_3, window_bounds = array<i64: 8, 128>}]} {
    %c0 = arith.constant 0 : index
    %c0_0 = arith.constant 0 : index
    %0 = vector.load %arg1[%c0, %c0_0] : memref<8x128xf32, #tpu.memory_space<vmem>>, vector<8x128xf32>
    %c0_1 = arith.constant 0 : index
    %c0_2 = arith.constant 0 : index
    %1 = vector.load %arg2[%c0_1, %c0_2] : memref<128x128xf32, #tpu.memory_space<vmem>>, vector<128x128xf32>
    %cst = arith.constant dense<0.000000e+00> : vector<8x128xf32>
    %2 = tpu.matmul %0, %1, %cst {dimension_numbers = #tpu.dot_dimension_numbers<[1], [0], [0], [1], [0, 0, 1, 1], [], []>} : vector<8x128xf32>, vector<128x128xf32>, vector<8x128xf32> -> vector<8x128xf32>
    %c0_3 = arith.constant 0 : index
    %c0_4 = arith.constant 0 : index
    %3 = vector.load %arg3[%c0_3, %c0_4] : memref<1x128xf32, #tpu.memory_space<vmem>>, vector<1x128xf32>
    %4 = vector.broadcast %3 : vector<1x128xf32> to vector<8x128xf32>
    %5 = arith.addf %2, %4 : vector<8x128xf32>
    %c0_5 = arith.constant 0 : index
    %c0_6 = arith.constant 0 : index
    %6 = vector.load %arg4[%c0_5, %c0_6] : memref<8x128xf32, #tpu.memory_space<vmem>>, vector<8x128xf32>
    tpu.vector_store %arg4[%c0_5, %c0_6], %5 {strides = array<i32>} : memref<8x128xf32, #tpu.memory_space<vmem>>, vector<8x128xf32>,
    return
  }
  func.func @transform_0(%arg0: i32) -> (i32, i32) {
    %c0_i32 = arith.constant 0 : i32
    %c0_i32_0 = arith.constant 0 : i32
    return %arg0, %c0_i32 : i32, i32
  }
  func.func @transform_1(%arg0: i32) -> (i32, i32) {
    %c0_i32 = arith.constant 0 : i32
    %c0_i32_0 = arith.constant 0 : i32
    %c0_i32_1 = arith.constant 0 : i32
    return %c0_i32, %c0_i32_0 : i32, i32
  }
  func.func @transform_2(%arg0: i32) -> (i32, i32) {
    %c0_i32 = arith.constant 0 : i32
    %c0_i32_0 = arith.constant 0 : i32
    %c0_i32_1 = arith.constant 0 : i32
    return %c0_i32, %c0_i32_0 : i32, i32
  }
  func.func @transform_3(%arg0: i32) -> (i32, i32) {
    %c0_i32 = arith.constant 0 : i32
    %c0_i32_0 = arith.constant 0 : i32
    return %arg0, %c0_i32 : i32, i32
  }
}

</mosaic_0001>

<bundles_post_ra>
// kernel: tile.8
= control target key start
LH: loop header
LB: loop body
LE: loop exit
PB: predicated region body
PF: predicated region fallthrough
CT: control target
= control target key end

     0   :  { %s28_s0 = inlined_call_operand.vmem [shape: f32[8], index: 0, kind: input, shape index: {}]   ;;  %s29_s1 = inlined_call_operand.vmem [shape: f32[16,8], index: 1, kind: output, shape index: {}]  }
   0x1   :  { %v4_v0 = vld [vmem:[%s28_s0] ss:$0 sm:$0xff] }
   0x2   :  { %5 = vst [vmem:[%s29_s1] sm:$0xff] %v4_v0 }
   0x3   :  { %8 = vst [vmem:[%s29_s1 + $0x8] sm:$0xff] %v4_v0 }

// kernel: tile.9
= control target key start
LH: loop header
LB: loop body
LE: loop exit
PB: predicated region body
PF: predicated region fallthrough
CT: control target
= control target key end

     0   :  { %s131_s10 = smov 120   ;;  %s132_s11 = smov 104   ;;  %vm3_vm0 = vcmask 64512   ;;  %vm9_vm1 = vcmask 1048512   ;;  %vm15_vm2 = vcmask 982912   ;;  %vm21_vm3 = vcmask 917312   ;;  %s207_s0 = inlined_call_operand.vmem [shape: f32[16,8], index: 0, kind: input, shape index: {}]   ;;  %s208_s1 = inlined_call_operand.vmem [shape: f32[1,128], index: 1, kind: output, shape index: {}]  }
   0x1   :  { %v101_v0 = vld [vmem:[%s207_s0 + $0xf] sm:$0x1]   ;;  %v103_v1 = vld [vmem:[%s207_s0 + $0xd] sm:$0x1]   ;;  %v105_v2 = vld [vmem:[%s207_s0 + $0xb] sm:$0x1]  }
   0x2   :  { %7 = vrot.lane.b32.xlu0 %v101_v0, %s131_s10  ;;  %19 = vrot.lane.b32.xlu1 %v103_v1, %s132_s11  ;;  %s133_s14 = smov 88   ;;  %v102_v3 = vld [vmem:[%s207_s0 + $0xe] sm:$0x1]   ;;  %v104_v4 = vld [vmem:[%s207_s0 + $0xc] sm:$0x1]   ;;  %s134_s19 = smov 112  }
   0x3   :  { %31 = vrot.lane.b32.xlu2 %v105_v2, %s133_s14  ;;  %s135_s20 = smov 96   ;;  %v106_v5 = vld [vmem:[%s207_s0 + $0xa] sm:$0x1]   ;;  %s136_s23 = smov 80   ;;  %v107_v6 = vld [vmem:[%s207_s0 + $0x9] sm:$0x1]  }
   0x4   :  { %v108_v7 = vld [vmem:[%s207_s0 + $0x8] sm:$0x1]   ;;  %s137_s28 = smov 72   ;;  %s138_s29 = smov 64   ;;  %v109_v8 = vld [vmem:[%s207_s0 + $0x7] sm:$0x1]  }
   0x5   :  { %s139_s3 = smov 56   ;;  %v110_v9 = vld [vmem:[%s207_s0 + $0x6] sm:$0x1]   ;;  %v111_v10 = vld [vmem:[%s207_s0 + $0x5] sm:$0x1]   ;;  %s140_s8 = smov 48  }
   0x6   :  { %s141_s9 = smov 40   ;;  %v112_v11 = vld [vmem:[%s207_s0 + $0x4] sm:$0x1]   ;;  %s142_s12 = smov 32   ;;  %v113_v12 = vld [vmem:[%s207_s0 + $0x3] sm:$0x1]  }
   0x7   :  { %v114_v13 = vld [vmem:[%s207_s0 + $0x2] sm:$0x1]   ;;  %s143_s17 = smov 24   ;;  %s144_s18 = smov 16   ;;  %v115_v14 = vld [vmem:[%s207_s0 + $0x1] sm:$0x1]  }
   0x8   :  { %s145_s21 = smov 8   ;;  %v2_v15 = vld [vmem:[%s207_s0] sm:$0x1]   ;;  %vm27_vm4 = vcmask 851712   ;;  %vm33_vm5 = vcmask 786112   ;;  %vm39_vm6 = vcmask 720512  }
   0x9   :  { %4 = vst.msk [vmem:[#allocation0] sm:$0x1] %vm3_vm0, %v2_v15   ;;  %vm45_vm7 = vcmask 654912   ;;  %vm51_vm8 = vcmask 589312   ;;  %vm57_vm9 = vcmask 523712   ;;  %vm63_vm10 = vcmask 458112  }
   0xa   :  { %13 = vrot.lane.b32.xlu0 %v102_v3, %s134_s19  ;;  %25 = vrot.lane.b32.xlu1 %v104_v4, %s135_s20  ;;  %vm69_vm11 = vcmask 392512   ;;  %vm75_vm12 = vcmask 326912   ;;  %vm81_vm13 = vcmask 261312   ;;  %vm87_vm14 = vcmask 195712  }
   0xb   :  { %37 = vrot.lane.b32.xlu2 %v106_v5, %s136_s23  ;;  %vm93_vm15 = vcmask 130112  }
  0x12   :  { %43 = vrot.lane.b32.xlu0 %v107_v6, %s137_s28  ;;  %49 = vrot.lane.b32.xlu1 %v108_v7, %s138_s29 }
  0x13   :  { %55 = vrot.lane.b32.xlu2 %v109_v8, %s139_s3 }
  0x1a   :  { %61 = vrot.lane.b32.xlu0 %v110_v9, %s140_s8  ;;  %67 = vrot.lane.b32.xlu1 %v111_v10, %s141_s9 }
  0x1b   :  { %73 = vrot.lane.b32.xlu2 %v112_v11, %s142_s12 }
  0x22   :  { %79 = vrot.lane.b32.xlu0 %v113_v12, %s143_s17  ;;  %85 = vrot.lane.b32.xlu1 %v114_v13, %s144_s18 }
  0x23   :  { %91 = vrot.lane.b32.xlu2 %v115_v14, %s145_s21 }
  0x5d   :  { %v32_v16 = vpop.permute.xlu2 %31  }
  0x65   :  { %v38_v17 = vpop.permute.xlu2 %37  }
  0x6d   :  { %v56_v18 = vpop.permute.xlu2 %55  }
  0x74   :  { %v8_v19 = vpop.permute.xlu0 %7   ;;  %v20_v20 = vpop.permute.xlu1 %19  }
  0x75   :  { %10 = vst.msk [vmem:[#allocation0] sm:$0x1] %vm9_vm1, %v8_v19   ;;  %v74_v21 = vpop.permute.xlu2 %73  }
  0x7c   :  { %v14_v22 = vpop.permute.xlu0 %13   ;;  %v26_v23 = vpop.permute.xlu1 %25  }
  0x7d   :  { %16 = vst.msk [vmem:[#allocation0] sm:$0x1] %vm15_vm2, %v14_v22   ;;  %v92_v24 = vpop.permute.xlu2 %91  }
  0x7e   :  { %22 = vst.msk [vmem:[#allocation0] sm:$0x1] %vm21_vm3, %v20_v20  }
  0x7f   :  { %28 = vst.msk [vmem:[#allocation0] sm:$0x1] %vm27_vm4, %v26_v23  }
  0x80   :  { %34 = vst.msk [vmem:[#allocation0] sm:$0x1] %vm33_vm5, %v32_v16  }
  0x81   :  { %40 = vst.msk [vmem:[#allocation0] sm:$0x1] %vm39_vm6, %v38_v17  }
  0x84   :  { %v44_v25 = vpop.permute.xlu0 %43   ;;  %v50_v26 = vpop.permute.xlu1 %49  }
  0x85   :  { %46 = vst.msk [vmem:[#allocation0] sm:$0x1] %vm45_vm7, %v44_v25  }
  0x86   :  { %52 = vst.msk [vmem:[#allocation0] sm:$0x1] %vm51_vm8, %v50_v26  }
  0x87   :  { %58 = vst.msk [vmem:[#allocation0] sm:$0x1] %vm57_vm9, %v56_v18  }
  0x8c   :  { %v62_v27 = vpop.permute.xlu0 %61   ;;  %v68_v28 = vpop.permute.xlu1 %67  }
  0x8d   :  { %64 = vst.msk [vmem:[#allocation0] sm:$0x1] %vm63_vm10, %v62_v27  }
  0x8e   :  { %70 = vst.msk [vmem:[#allocation0] sm:$0x1] %vm69_vm11, %v68_v28  }
  0x8f   :  { %76 = vst.msk [vmem:[#allocation0] sm:$0x1] %vm75_vm12, %v74_v21  }
  0x94   :  { %v80_v29 = vpop.permute.xlu0 %79   ;;  %v86_v30 = vpop.permute.xlu1 %85  }
  0x95   :  { %82 = vst.msk [vmem:[#allocation0] sm:$0x1] %vm81_vm13, %v80_v29  }
  0x96   :  { %88 = vst.msk [vmem:[#allocation0] sm:$0x1] %vm87_vm14, %v86_v30  }
  0x97   :  { %94 = vst.msk [vmem:[#allocation0] sm:$0x1] %vm93_vm15, %v92_v24  }
  0x9e   :  { %v97_v31 = vld [vmem:[#allocation0] sm:$0x1] }
  0x9f   :  { %100 = vst [vmem:[%s208_s1] sm:$0x1] %v97_v31 }

// kernel: my_autoencoder_forward.1
= control target key start
LH: loop header
LB: loop body
LE: loop exit
PB: predicated region body
PF: predicated region fallthrough
CT: control target
= control target key end

     0   :  { %s138_s1 = inlined_call_operand.vmem [shape: f32[128,128], index: 1, kind: input, shape index: {}]   ;;  %s139_s2 = inlined_call_operand.vmem [shape: f32[1,128], index: 2, kind: input, shape index: {}]   ;;  %s140_s0 = inlined_call_operand.vmem [shape: f32[8,128], index: 0, kind: input, shape index: {}]   ;;  %s141_s3 = inlined_call_operand.vmem [shape: f32[8,128], index: 3, kind: output, shape index: {}]  }
   0x1   :  { %v30_v0 = vld [vmem:[%s138_s1 + $0x78] sm:$0xff]  ;;  %v29_v1 = vld [vmem:[%s138_s1 + $0x70] sm:$0xff]  ;;  %v28_v2 = vld [vmem:[%s138_s1 + $0x68] sm:$0xff] }
   0x2   :  { %35 = vmatpush.msra.mxu0 %v30_v0  ;;  %v27_v3 = vld [vmem:[%s138_s1 + $0x60] sm:$0xff]  ;;  %v26_v4 = vld [vmem:[%s138_s1 + $0x58] sm:$0xff]  ;;  %v25_v5 = vld [vmem:[%s138_s1 + $0x50] sm:$0xff] }
   0x3   :  { %v24_v6 = vld [vmem:[%s138_s1 + $0x48] sm:$0xff]  ;;  %v23_v7 = vld [vmem:[%s138_s1 + $0x40] sm:$0xff]  ;;  %v22_v8 = vld [vmem:[%s138_s1 + $0x38] sm:$0xff] }
   0x4   :  { %36 = vmatpush.msra.mxu0 %v29_v1  ;;  %v21_v9 = vld [vmem:[%s138_s1 + $0x30] sm:$0xff]  ;;  %v20_v10 = vld [vmem:[%s138_s1 + $0x28] sm:$0xff]  ;;  %v19_v11 = vld [vmem:[%s138_s1 + $0x20] sm:$0xff] }
   0x5   :  { %v18_v12 = vld [vmem:[%s138_s1 + $0x18] sm:$0xff]  ;;  %v17_v13 = vld [vmem:[%s138_s1 + $0x10] sm:$0xff]  ;;  %v16_v14 = vld [vmem:[%s138_s1 + $0x8] sm:$0xff] }
   0x6   :  { %37 = vmatpush.msra.mxu0 %v28_v2  ;;  %v15_v15 = vld [vmem:[%s138_s1] sm:$0xff] }
   0x7   :  { %v14_v16 = vld [vmem:[%s140_s0] sm:$0xff] }
   0x8   :  { %38 = vmatpush.msra.mxu0 %v27_v3  ;;  %v60_v17 = vld [vmem:[%s139_s2] ss:$0 sm:$0xff] }
   0xa   :  { %39 = vmatpush.msra.mxu0 %v26_v4 }
   0xc   :  { %40 = vmatpush.msra.mxu0 %v25_v5 }
   0xe   :  { %41 = vmatpush.msra.mxu0 %v24_v6 }
  0x10   :  { %42 = vmatpush.msra.mxu0 %v23_v7 }
  0x12   :  { %43 = vmatpush.msra.mxu0 %v22_v8 }
  0x14   :  { %44 = vmatpush.msra.mxu0 %v21_v9 }
  0x16   :  { %45 = vmatpush.msra.mxu0 %v20_v10 }
  0x18   :  { %46 = vmatpush.msra.mxu0 %v19_v11 }
  0x1a   :  { %47 = vmatpush.msra.mxu0 %v18_v12 }
  0x1c   :  { %48 = vmatpush.msra.mxu0 %v17_v13 }
  0x1e   :  { %49 = vmatpush.msra.mxu0 %v16_v14 }
  0x20   :  { %50 = vmatpush.msra.mxu0 %v15_v15 }
  0x21   :  { %51 = vmatmul.f32.vlgmr.msra.gmra.mxu0 %v14_v16 }
  0x9e   :  { %v52_v18 = vpop.f32.mrf.mxu0 }
  0x9f   :  { %v53_v19 = vadd.f32 %v60_v17, %v52_v18 }
  0xa1   :  { %55 = vst [vmem:[%s141_s3] sm:$0xff] %v53_v19 }

</bundles_post_ra>
